<compile_context>
chip_gen: v7x
topology: tpu7x:2x2x1
jax: 0.10.0
libtpu: 0.0.40
codegen_flags: <defaults>
</compile_context>

<pallas_src>
import functools
import math

import jax
import jax.numpy as jnp
from jax.experimental import pallas as pl
from jax.experimental.pallas import tpu as pltpu


def _round_up(v, m):
    return (v + m - 1) // m * m


def _mln_kernel(use_ln, eps,
                x_ref, c_ref, wr_ref, br_ref, wg_ref, bg_ref,
                wb_ref, bb_ref, o_ref):
    """One tile of tokens: LN(x) modulated by gamma/beta predicted from c."""
    x = x_ref[...].astype(jnp.float32)
    if use_ln:
        mean = jnp.mean(x, axis=-1, keepdims=True)
        var = jnp.mean(jnp.square(x - mean), axis=-1, keepdims=True)
        x = (x - mean) * jax.lax.rsqrt(var + eps)   # EUP rsqrt, no VALU divide

    def affine(a, w_ref, b_ref):
        w = w_ref[...]
        if w.dtype != jnp.float32:        # bf16 weights -> feed MXU bf16 operands
            a = a.astype(w.dtype)
        return (jnp.dot(a, w, preferred_element_type=jnp.float32)
                + b_ref[...].astype(jnp.float32))

    h = jnp.maximum(affine(c_ref[...], wr_ref, br_ref), 0.0)   # reduce + ReLU
    gamma = affine(h, wg_ref, bg_ref)
    beta = affine(h, wb_ref, bb_ref)

    o_ref[...] = (gamma * x + beta).astype(o_ref.dtype)


def mln_forward(x, c, params, *, use_ln=True, eps=1e-5, tm=256):
    """Pallas implementation of MLN.forward.

    x : (..., f_dim)   feature tensor
    c : (..., c_dim)   latent code, same leading dims as x
    params: dict with 'w_reduce','b_reduce','w_gamma','b_gamma','w_beta','b_beta'
            (Linear weights already transposed to (in, out), biases (1, out)).
    """
    lead = x.shape[:-1]
    F = x.shape[-1]
    Cdim = c.shape[-1]
    assert c.shape[:-1] == lead, "x and c must share leading (token) dims"

    M = int(math.prod(lead)) if lead else 1
    # Tile: multiple of 8 sublanes, never larger than the padded token count.
    tm_eff = max(8, min(_round_up(tm, 8), _round_up(M, 8)))
    M_pad = _round_up(M, tm_eff)

    x2 = x.reshape(M, F)
    c2 = c.reshape(M, Cdim)
    if M_pad != M:                   # pad tokens; padded rows are sliced off below
        x2 = jnp.pad(x2, ((0, M_pad - M), (0, 0)))
        c2 = jnp.pad(c2, ((0, M_pad - M), (0, 0)))

    weights = [params['w_reduce'], params['b_reduce'],
               params['w_gamma'], params['b_gamma'],
               params['w_beta'], params['b_beta']]

    def tok_spec(cols):
        return pl.BlockSpec((tm_eff, cols), lambda i: (i, 0))

    def full_spec(a):
        return pl.BlockSpec(a.shape, lambda i: (0,) * a.ndim)

    # Scoped-VMEM budget: double-buffered token tiles + (conservatively double-
    # buffered) resident weights, clamped to stay inside every generation.
    act_bytes = 2 * tm_eff * (F + Cdim + F) * max(x.dtype.itemsize, 4)
    w_bytes = 2 * sum(w.size * w.dtype.itemsize for w in weights)
    vmem_limit = int(min(max(act_bytes + w_bytes + (4 << 20), 16 << 20), 48 << 20))

    out = pl.pallas_call(
        functools.partial(_mln_kernel, use_ln, eps),
        out_shape=jax.ShapeDtypeStruct((M_pad, F), x.dtype),
        grid_spec=pltpu.PrefetchScalarGridSpec(
            num_scalar_prefetch=0,
            grid=(M_pad // tm_eff,),
            in_specs=[tok_spec(F), tok_spec(Cdim)] + [full_spec(w) for w in weights],
            out_specs=pl.BlockSpec((tm_eff, F), lambda i: (i, 0)),
        ),
        compiler_params=pltpu.CompilerParams(
            dimension_semantics=("parallel",),
            vmem_limit_bytes=vmem_limit),
    )(x2, c2, *weights)

    if M_pad != M:
        out = out[:M]
    return out.reshape(*lead, F)


def _reference(x, c, p, *, use_ln=True, eps=1e-5):
    """Pure-JAX reference mirroring the PyTorch forward (f32 math)."""
    xf = x.astype(jnp.float32)
    cf = c.astype(jnp.float32)
    if use_ln:
        mean = jnp.mean(xf, axis=-1, keepdims=True)
        var = jnp.mean(jnp.square(xf - mean), axis=-1, keepdims=True)
        xf = (xf - mean) * jax.lax.rsqrt(var + eps)
    wr = p['w_reduce'].astype(jnp.float32); br = p['b_reduce'].astype(jnp.float32)
    wg = p['w_gamma'].astype(jnp.float32);  bg = p['b_gamma'].astype(jnp.float32)
    wb = p['w_beta'].astype(jnp.float32);   bb = p['b_beta'].astype(jnp.float32)
    h = jnp.maximum(jnp.dot(cf, wr, preferred_element_type=jnp.float32) + br, 0.0)
    gamma = jnp.dot(h, wg, preferred_element_type=jnp.float32) + bg
    beta = jnp.dot(h, wb, preferred_element_type=jnp.float32) + bb
    return (gamma * xf + beta).astype(x.dtype)


def _init_params(key, c_dim, f_dim, *, torch_reset=False, dtype=jnp.float32):
    """PyTorch-Linear-style init; optionally MLN.reset_parameters() values."""
    def linear(k, fan_in, fan_out):
        kw, kb = jax.random.split(k)
        bound = 1.0 / math.sqrt(fan_in)
        w = jax.random.uniform(kw, (fan_in, fan_out), jnp.float32, -bound, bound)
        b = jax.random.uniform(kb, (1, fan_out), jnp.float32, -bound, bound)
        return w, b

    k1, k2, k3 = jax.random.split(key, 3)
    p = {}
    p['w_reduce'], p['b_reduce'] = linear(k1, c_dim, f_dim)
    if torch_reset:
        # reset_parameters(): gamma.weight=0, gamma.bias=1, beta.weight=0, beta.bias=0
        p['w_gamma'] = jnp.zeros((f_dim, f_dim), jnp.float32)
        p['b_gamma'] = jnp.ones((1, f_dim), jnp.float32)
        p['w_beta'] = jnp.zeros((f_dim, f_dim), jnp.float32)
        p['b_beta'] = jnp.zeros((1, f_dim), jnp.float32)
    else:
        p['w_gamma'], p['b_gamma'] = linear(k2, f_dim, f_dim)
        p['w_beta'], p['b_beta'] = linear(k3, f_dim, f_dim)
    return {k: v.astype(dtype) for k, v in p.items()}


if __name__ == "__main__":
    B, N = 2, 8
    c_dim, f_dim = 32, 256        # module default f_dim=256 -> lane-dense output

    key = jax.random.PRNGKey(0)
    kx, kc, kp = jax.random.split(key, 3)
    x = jax.random.normal(kx, (B, N, f_dim), jnp.float32)
    c = jax.random.normal(kc, (B, N, c_dim), jnp.float32)

    # 1) random weights, use_ln=True
    params = _init_params(kp, c_dim, f_dim)
    out = jax.block_until_ready(mln_forward(x, c, params))
    assert out.shape == (B, N, f_dim)
    assert jnp.allclose(out, _reference(x, c, params), atol=1e-4, rtol=1e-4)

    # 2) use_ln=False path
    out_noln = jax.block_until_ready(mln_forward(x, c, params, use_ln=False))
    assert jnp.allclose(out_noln, _reference(x, c, params, use_ln=False),
                        atol=1e-4, rtol=1e-4)

    # 3) module's reset_parameters() init: output must equal LayerNorm(x)
    params0 = _init_params(kp, c_dim, f_dim, torch_reset=True)
    out0 = jax.block_until_ready(mln_forward(x, c, params0))
    assert jnp.allclose(out0, _reference(x, c, params0), atol=1e-4, rtol=1e-4)

    # 4) token count not divisible by the tile -> wrapper padding path
    x3, c3 = x[:, :7, :], c[:, :7, :]
    out3 = jax.block_until_ready(mln_forward(x3, c3, params))
    assert jnp.allclose(out3, _reference(x3, c3, params), atol=1e-4, rtol=1e-4)

    # 5) bf16 inputs/weights: bf16 MXU operands with f32 accumulation
    xb, cb = x.astype(jnp.bfloat16), c.astype(jnp.bfloat16)
    pb = {k: v.astype(jnp.bfloat16) for k, v in params.items()}
    outb = jax.block_until_ready(mln_forward(xb, cb, pb))
    refb = _reference(xb, cb, pb)
    assert outb.dtype == jnp.bfloat16
    assert jnp.allclose(outb.astype(jnp.float32), refb.astype(jnp.float32),
                        atol=5e-2, rtol=5e-2)

    print("KERNEL_OK")
</pallas_src>

<mosaic_0001>
module attributes {stable_mosaic.version = 11 : i64} {
  func.func @_mln_kernel(%arg0: i32, %arg1: memref<16x256xf32, #tpu.memory_space<vmem>>, %arg2: memref<16x32xf32, #tpu.memory_space<vmem>>, %arg3: memref<32x256xf32, #tpu.memory_space<vmem>>, %arg4: memref<1x256xf32, #tpu.memory_space<vmem>>, %arg5: memref<256x256xf32, #tpu.memory_space<vmem>>, %arg6: memref<1x256xf32, #tpu.memory_space<vmem>>, %arg7: memref<256x256xf32, #tpu.memory_space<vmem>>, %arg8: memref<1x256xf32, #tpu.memory_space<vmem>>, %arg9: memref<16x256xf32, #tpu.memory_space<vmem>>) attributes {dimension_semantics = [#tpu.dimension_semantics<parallel>], iteration_bounds = array<i64: 1>, scalar_prefetch = 0 : i64, scratch_operands = 0 : i64, tpu.core_type = #tpu.core_type<tc>, window_params = [{transform_indices = @transform_0, window_bounds = array<i64: 16, 256>}, {transform_indices = @transform_1, window_bounds = array<i64: 16, 32>}, {pipeline_mode = #tpu.pipeline_mode<synchronous>, transform_indices = @transform_2, window_bounds = array<i64: 32, 256>}, {pipeline_mode = #tpu.pipeline_mode<synchronous>, transform_indices = @transform_3, window_bounds = array<i64: 1, 256>}, {pipeline_mode = #tpu.pipeline_mode<synchronous>, transform_indices = @transform_4, window_bounds = array<i64: 256, 256>}, {pipeline_mode = #tpu.pipeline_mode<synchronous>, transform_indices = @transform_5, window_bounds = array<i64: 1, 256>}, {pipeline_mode = #tpu.pipeline_mode<synchronous>, transform_indices = @transform_6, window_bounds = array<i64: 256, 256>}, {pipeline_mode = #tpu.pipeline_mode<synchronous>, transform_indices = @transform_7, window_bounds = array<i64: 1, 256>}, {transform_indices = @transform_8, window_bounds = array<i64: 16, 256>}]} {
    %c0 = arith.constant 0 : index
    %c0_0 = arith.constant 0 : index
    %0 = vector.load %arg1[%c0, %c0_0] : memref<16x256xf32, #tpu.memory_space<vmem>>, vector<16x256xf32>
    %cst = arith.constant dense<0.000000e+00> : vector<16xf32>
    %1 = vector.multi_reduction <add>, %0, %cst [1] : vector<16x256xf32> to vector<16xf32>
    %2 = vector.shape_cast %1 : vector<16xf32> to vector<16x1xf32>
    %cst_1 = arith.constant 2.560000e+02 : f32
    %3 = vector.broadcast %cst_1 : f32 to vector<16x1xf32>
    %4 = arith.divf %2, %3 : vector<16x1xf32>
    %5 = vector.broadcast %4 : vector<16x1xf32> to vector<16x256xf32>
    %6 = arith.subf %0, %5 : vector<16x256xf32>
    %7 = arith.mulf %6, %6 : vector<16x256xf32>
    %cst_2 = arith.constant dense<0.000000e+00> : vector<16xf32>
    %8 = vector.multi_reduction <add>, %7, %cst_2 [1] : vector<16x256xf32> to vector<16xf32>
    %9 = vector.shape_cast %8 : vector<16xf32> to vector<16x1xf32>
    %cst_3 = arith.constant 2.560000e+02 : f32
    %10 = vector.broadcast %cst_3 : f32 to vector<16x1xf32>
    %11 = arith.divf %9, %10 : vector<16x1xf32>
    %12 = vector.broadcast %4 : vector<16x1xf32> to vector<16x256xf32>
    %13 = arith.subf %0, %12 : vector<16x256xf32>
    %cst_4 = arith.constant 9.99999974E-6 : f32
    %14 = vector.broadcast %cst_4 : f32 to vector<16x1xf32>
    %15 = arith.addf %11, %14 : vector<16x1xf32>
    %16 = math.rsqrt %15 : vector<16x1xf32>
    %17 = vector.broadcast %16 : vector<16x1xf32> to vector<16x256xf32>
    %18 = arith.mulf %13, %17 : vector<16x256xf32>
    %c0_5 = arith.constant 0 : index
    %c0_6 = arith.constant 0 : index
    %19 = vector.load %arg2[%c0_5, %c0_6] : memref<16x32xf32, #tpu.memory_space<vmem>>, vector<16x32xf32>
    %c0_7 = arith.constant 0 : index
    %c0_8 = arith.constant 0 : index
    %20 = vector.load %arg3[%c0_7, %c0_8] : memref<32x256xf32, #tpu.memory_space<vmem>>, vector<32x256xf32>
    %cst_9 = arith.constant dense<0.000000e+00> : vector<16x256xf32>
    %21 = tpu.matmul %19, %20, %cst_9 {dimension_numbers = #tpu.dot_dimension_numbers<[1], [0], [0], [1], [0, 0, 1, 1], [], []>} : vector<16x32xf32>, vector<32x256xf32>, vector<16x256xf32> -> vector<16x256xf32>
    %c0_10 = arith.constant 0 : index
    %c0_11 = arith.constant 0 : index
    %22 = vector.load %arg4[%c0_10, %c0_11] : memref<1x256xf32, #tpu.memory_space<vmem>>, vector<1x256xf32>
    %23 = vector.broadcast %22 : vector<1x256xf32> to vector<16x256xf32>
    %24 = arith.addf %21, %23 : vector<16x256xf32>
    %cst_12 = arith.constant 0.000000e+00 : f32
    %25 = vector.broadcast %cst_12 : f32 to vector<16x256xf32>
    %26 = arith.maximumf %24, %25 : vector<16x256xf32>
    %c0_13 = arith.constant 0 : index
    %c0_14 = arith.constant 0 : index
    %27 = vector.load %arg5[%c0_13, %c0_14] : memref<256x256xf32, #tpu.memory_space<vmem>>, vector<256x256xf32>
    %cst_15 = arith.constant dense<0.000000e+00> : vector<16x256xf32>
    %28 = tpu.matmul %26, %27, %cst_15 {dimension_numbers = #tpu.dot_dimension_numbers<[1], [0], [0], [1], [0, 0, 1, 1], [], []>} : vector<16x256xf32>, vector<256x256xf32>, vector<16x256xf32> -> vector<16x256xf32>
    %c0_16 = arith.constant 0 : index
    %c0_17 = arith.constant 0 : index
    %29 = vector.load %arg6[%c0_16, %c0_17] : memref<1x256xf32, #tpu.memory_space<vmem>>, vector<1x256xf32>
    %30 = vector.broadcast %29 : vector<1x256xf32> to vector<16x256xf32>
    %31 = arith.addf %28, %30 : vector<16x256xf32>
    %c0_18 = arith.constant 0 : index
    %c0_19 = arith.constant 0 : index
    %32 = vector.load %arg7[%c0_18, %c0_19] : memref<256x256xf32, #tpu.memory_space<vmem>>, vector<256x256xf32>
    %cst_20 = arith.constant dense<0.000000e+00> : vector<16x256xf32>
    %33 = tpu.matmul %26, %32, %cst_20 {dimension_numbers = #tpu.dot_dimension_numbers<[1], [0], [0], [1], [0, 0, 1, 1], [], []>} : vector<16x256xf32>, vector<256x256xf32>, vector<16x256xf32> -> vector<16x256xf32>
    %c0_21 = arith.constant 0 : index
    %c0_22 = arith.constant 0 : index
    %34 = vector.load %arg8[%c0_21, %c0_22] : memref<1x256xf32, #tpu.memory_space<vmem>>, vector<1x256xf32>
    %35 = vector.broadcast %34 : vector<1x256xf32> to vector<16x256xf32>
    %36 = arith.addf %33, %35 : vector<16x256xf32>
    %37 = arith.mulf %31, %18 : vector<16x256xf32>
    %38 = arith.addf %37, %36 : vector<16x256xf32>
    %c0_23 = arith.constant 0 : index
    %c0_24 = arith.constant 0 : index
    %39 = vector.load %arg9[%c0_23, %c0_24] : memref<16x256xf32, #tpu.memory_space<vmem>>, vector<16x256xf32>
    tpu.vector_store %arg9[%c0_23, %c0_24], %38 {strides = array<i32>} : memref<16x256xf32, #tpu.memory_space<vmem>>, vector<16x256xf32>,
    return
  }
  func.func @transform_0(%arg0: i32) -> (i32, i32) {
    %c0_i32 = arith.constant 0 : i32
    %c0_i32_0 = arith.constant 0 : i32
    return %arg0, %c0_i32 : i32, i32
  }
  func.func @transform_1(%arg0: i32) -> (i32, i32) {
    %c0_i32 = arith.constant 0 : i32
    %c0_i32_0 = arith.constant 0 : i32
    return %arg0, %c0_i32 : i32, i32
  }
  func.func @transform_2(%arg0: i32) -> (i32, i32) {
    %c0_i32 = arith.constant 0 : i32
    %c0_i32_0 = arith.constant 0 : i32
    %c0_i32_1 = arith.constant 0 : i32
    return %c0_i32, %c0_i32_0 : i32, i32
  }
  func.func @transform_3(%arg0: i32) -> (i32, i32) {
    %c0_i32 = arith.constant 0 : i32
    %c0_i32_0 = arith.constant 0 : i32
    %c0_i32_1 = arith.constant 0 : i32
    return %c0_i32, %c0_i32_0 : i32, i32
  }
  func.func @transform_4(%arg0: i32) -> (i32, i32) {
    %c0_i32 = arith.constant 0 : i32
    %c0_i32_0 = arith.constant 0 : i32
    %c0_i32_1 = arith.constant 0 : i32
    return %c0_i32, %c0_i32_0 : i32, i32
  }
  func.func @transform_5(%arg0: i32) -> (i32, i32) {
    %c0_i32 = arith.constant 0 : i32
    %c0_i32_0 = arith.constant 0 : i32
    %c0_i32_1 = arith.constant 0 : i32
    return %c0_i32, %c0_i32_0 : i32, i32
  }
  func.func @transform_6(%arg0: i32) -> (i32, i32) {
    %c0_i32 = arith.constant 0 : i32
    %c0_i32_0 = arith.constant 0 : i32
    %c0_i32_1 = arith.constant 0 : i32
    return %c0_i32, %c0_i32_0 : i32, i32
  }
  func.func @transform_7(%arg0: i32) -> (i32, i32) {
    %c0_i32 = arith.constant 0 : i32
    %c0_i32_0 = arith.constant 0 : i32
    %c0_i32_1 = arith.constant 0 : i32
    return %c0_i32, %c0_i32_0 : i32, i32
  }
  func.func @transform_8(%arg0: i32) -> (i32, i32) {
    %c0_i32 = arith.constant 0 : i32
    %c0_i32_0 = arith.constant 0 : i32
    return %arg0, %c0_i32 : i32, i32
  }
}

</mosaic_0001>

<bundles_post_ra>
// kernel: tpu_custom_call.1
= control target key start
LH: loop header
LB: loop body
LE: loop exit
PB: predicated region body
PF: predicated region fallthrough
CT: control target
= control target key end

     0   :  { %13 = vsyncpa [#allocation3], 0  ;;  %s1053_s0 = inlined_call_operand.hbm [shape: f32[16,256], index: 0, kind: input, shape index: {}]   ;;  %s1054_s1 = inlined_call_operand.hbm [shape: f32[16,32], index: 1, kind: input, shape index: {}]   ;;  %s1055_s2 = inlined_call_operand.hbm [shape: f32[32,256], index: 2, kind: input, shape index: {}]   ;;  %s1056_s3 = inlined_call_operand.vmem [shape: f32[1,256], index: 3, kind: input, shape index: {}]   ;;  %s1057_s4 = inlined_call_operand.hbm [shape: f32[256,256], index: 4, kind: input, shape index: {}]   ;;  %s1058_s5 = inlined_call_operand.vmem [shape: f32[1,256], index: 5, kind: input, shape index: {}]   ;;  %s1059_s6 = inlined_call_operand.hbm [shape: f32[256,256], index: 6, kind: input, shape index: {}]   ;;  %s1060_s7 = inlined_call_operand.vmem [shape: f32[1,256], index: 7, kind: input, shape index: {}]   ;;  %s1061_s8 = inlined_call_operand.hbm [shape: f32[16,256], index: 8, kind: output, shape index: {}]  }
   0x1   :  { %14 = vsyncpa [#allocation6], 0 }
   0x2   :  { %15 = vsyncpa [#allocation9], 0 }
   0x3   :  { %16 = vsyncpa [#allocation4], 0  ;;  %s875_s27 = smov [#allocation5]   ;;  %s735_s9 = scalar_lea.hbm %s1054_s1, 256 }
   0x4   :  { %s34_s28 = sshll.u32 %s875_s27, 4  ;;  %p736_p0 = scmp.ne.s32.totalorder %s1054_s1, %s735_s9  ;;  %s35_s28 = int_to_ptr.vmem [resolvable:$true] %s34_s28 }
   0x5   :  { %p739_p1 = scmp.lt.u32.totalorder %s735_s9, %s1054_s1 }
   0x7   :  { %p741_p2 = pnand %p739_p1, %p736_p0 }
   0x9   :  { %744 = shalt.err (!%p741_p2)
}
   0xa   :  { %s745_s14 = scalar_lea.vmem %s35_s28, 256  ;;  %p750_p4 = scmp.lt.s32.totalorder %s35_s28, %s35_s28 }
   0xb   :  { %p746_p3 = scmp.ne.s32.totalorder %s35_s28, %s745_s14  ;;  %p751_p5 = scmp.lt.s32.totalorder %s745_s14, %s745_s14 }
   0xd   :  { %p752_p6 = por %p751_p5, %p750_p4 }
   0xf   :  { %p753_p7 = pnand %p752_p6, %p746_p3 }
  0x11   :  { %756 = shalt.err (!%p753_p7)
}
  0x12   :  { %s876_s15 = smov 128   ;;  %s877_s16 = smov 8  }
  0x13   :  { %40 = dma.hbm_to_vmem [thread:$0]  %s1054_s1, 256, %s35_s28, [#allocation6], %s876_s15, %s876_s15, %s877_s16  }
  0x14   :  { %s878_s19 = smov [#allocation8]   ;;  %s879_s21 = smov [#allocation2]  }
  0x15   :  { %s60_s20 = sshll.u32 %s878_s19, 4  ;;  %s22_s22 = sshll.u32 %s879_s21, 4  ;;  %s61_s20 = int_to_ptr.vmem [resolvable:$true] %s60_s20  ;;  %s23_s22 = int_to_ptr.vmem [resolvable:$true] %s22_s22 }
  0x16   :  { %s757_s25 = scalar_lea.hbm %s1057_s4, 8192 }
  0x17   :  { %p758_p8 = scmp.ne.s32.totalorder %s1057_s4, %s757_s25  ;;  %p761_p9 = scmp.lt.u32.totalorder %s757_s25, %s1057_s4 }
  0x19   :  { %p763_p10 = pnand %p761_p9, %p758_p8 }
  0x1b   :  { %766 = shalt.err (!%p763_p10)
}
  0x1c   :  { %s767_s1 = scalar_lea.vmem %s61_s20, 8192  ;;  %p772_p12 = scmp.lt.s32.totalorder %s61_s20, %s61_s20 }
  0x1d   :  { %p768_p11 = scmp.ne.s32.totalorder %s61_s20, %s767_s1  ;;  %p773_p13 = scmp.lt.s32.totalorder %s767_s1, %s767_s1 }
  0x1f   :  { %p774_p0 = por %p773_p13, %p772_p12 }
  0x21   :  { %p775_p1 = pnand %p774_p0, %p768_p11 }
  0x23   :  { %778 = shalt.err (!%p775_p1)
}
  0x24   :  { %s880_s28 = smov 256   ;;  %s881_s9 = smov 16  }
  0x25   :  { %66 = dma.hbm_to_vmem [thread:$0]  %s1057_s4, 8192, %s61_s20, [#allocation9], %s880_s28, %s880_s28, %s881_s9  }
  0x26   :  { %s779_s14 = scalar_lea.hbm %s1053_s0, 512 }
  0x27   :  { %p780_p2 = scmp.ne.s32.totalorder %s1053_s0, %s779_s14  ;;  %p783_p3 = scmp.lt.u32.totalorder %s779_s14, %s1053_s0 }
  0x29   :  { %p785_p4 = pnand %p783_p3, %p780_p2 }
  0x2b   :  { %788 = shalt.err (!%p785_p4)
}
  0x2c   :  { %s789_s19 = scalar_lea.vmem %s23_s22, 512  ;;  %p794_p6 = scmp.lt.s32.totalorder %s23_s22, %s23_s22 }
  0x2d   :  { %p790_p5 = scmp.ne.s32.totalorder %s23_s22, %s789_s19  ;;  %p795_p7 = scmp.lt.s32.totalorder %s789_s19, %s789_s19 }
  0x2f   :  { %p796_p8 = por %p795_p7, %p794_p6 }
  0x31   :  { %p797_p9 = pnand %p796_p8, %p790_p5 }
  0x33   :  { %800 = shalt.err (!%p797_p9)
}
  0x34   :  { %28 = dma.hbm_to_vmem [thread:$0]  %s1053_s0, 512, %s23_s22, [#allocation3], %s880_s28, %s880_s28, %s881_s9  }
  0x35   :  { %s882_s21 = smov [#allocation7]   ;;  %s883_s24 = smov [#allocation10]  }
  0x36   :  { %s46_s23 = sshll.u32 %s882_s21, 4  ;;  %s74_s25 = sshll.u32 %s883_s24, 4  ;;  %s47_s23 = int_to_ptr.vmem [resolvable:$true] %s46_s23  ;;  %s75_s25 = int_to_ptr.vmem [resolvable:$true] %s74_s25 }
  0x37   :  { %s801_s29 = scalar_lea.hbm %s1055_s2, 1024 }
  0x38   :  { %p802_p10 = scmp.ne.s32.totalorder %s1055_s2, %s801_s29  ;;  %p805_p11 = scmp.lt.u32.totalorder %s801_s29, %s1055_s2 }
  0x3a   :  { %p807_p12 = pnand %p805_p11, %p802_p10 }
  0x3c   :  { %810 = shalt.err (!%p807_p12)
}
  0x3d   :  { %s811_s0 = scalar_lea.vmem %s47_s23, 1024  ;;  %p816_p0 = scmp.lt.s32.totalorder %s47_s23, %s47_s23 }
  0x3e   :  { %p812_p13 = scmp.ne.s32.totalorder %s47_s23, %s811_s0  ;;  %p817_p1 = scmp.lt.s32.totalorder %s811_s0, %s811_s0 }
  0x40   :  { %p818_p2 = por %p817_p1, %p816_p0 }
  0x42   :  { %p819_p3 = pnand %p818_p2, %p812_p13 }
  0x44   :  { %822 = shalt.err (!%p819_p3)
}
  0x45   :  { %52 = dma.hbm_to_vmem [thread:$0]  %s1055_s2, 1024, %s47_s23, [#allocation6], %s880_s28, %s880_s28, %s881_s9  }
  0x46   :  { %s823_s15 = scalar_lea.hbm %s1059_s6, 8192 }
  0x47   :  { %p824_p4 = scmp.ne.s32.totalorder %s1059_s6, %s823_s15  ;;  %p827_p5 = scmp.lt.u32.totalorder %s823_s15, %s1059_s6 }
  0x49   :  { %p829_p6 = pnand %p827_p5, %p824_p4 }
  0x4b   :  { %832 = shalt.err (!%p829_p6)
}
  0x4c   :  { %s833_s4 = scalar_lea.vmem %s75_s25, 8192  ;;  %p838_p8 = scmp.lt.s32.totalorder %s75_s25, %s75_s25 }
  0x4d   :  { %p834_p7 = scmp.ne.s32.totalorder %s75_s25, %s833_s4  ;;  %p839_p9 = scmp.lt.s32.totalorder %s833_s4, %s833_s4 }
  0x4f   :  { %p840_p10 = por %p839_p9, %p838_p8 }
  0x51   :  { %p841_p11 = pnand %p840_p10, %p834_p7 }
  0x53   :  { %844 = shalt.err (!%p841_p11)
}
  0x54   :  { %80 = dma.hbm_to_vmem [thread:$0]  %s1059_s6, 8192, %s75_s25, [#allocation9], %s880_s28, %s880_s28, %s881_s9  }
  0x55   :  { %867 = dma.done.wait [#allocation3], 512  }
  0x56   :  { %868 = vsyncadd [#allocation3], 4294966784 }
  0x57   :  { %869 = dma.done.wait [#allocation6], 1280  }
  0x58   :  { %870 = vsyncadd [#allocation6], 4294966016 }
  0x59   :  { %871 = dma.done.wait [#allocation9], 16384  }
  0x5a   :  { %872 = vsyncadd [#allocation9], 4294950912  ;;  %v884_v0 = vmov 0.0   ;;  %v138_v1 = vld [vmem:[#allocation7 + $0x8] sm:$0xff]  ;;  %v140_v2 = vld [vmem:[#allocation7 + $0x18] sm:$0xff]  ;;  %vm157_vm0 = vcmask 261120  }
  0x5b   :  { %228 = vmatprep.mubr.f32.mxu0 %v884_v0  ;;  %v1003_v3 = vld [vmem:[#allocation2] sm:$0xff]  ;;  %v584_v4 = vpack.c.bf16 %v140_v2, %v138_v1  ;;  %v1005_v5 = vld [vmem:[#allocation2 + $0x8] sm:$0xff]  ;;  %v137_v6 = vld [vmem:[#allocation7] sm:$0xff] }
  0x5c   :  { %v139_v7 = vld [vmem:[#allocation7 + $0x10] sm:$0xff]  ;;  %v102_v8 = vadd.f32 %v1005_v5, %v1003_v3  ;;  %v142_v10 = vld [vmem:[#allocation7 + $0x28] sm:$0xff]  ;;  %v144_v11 = vld [vmem:[#allocation7 + $0x38] sm:$0xff] }
  0x5d   :  { %v586_v9 = vpack.c.bf16 %v139_v7, %v137_v6  ;;  %v1009_v12 = vld [vmem:[#allocation2 + $0x10] sm:$0xff]  ;;  %585 = vmatprep.subr.bf16.mxu0 %v584_v4  ;;  %v588_v13 = vpack.c.bf16 %v144_v11, %v142_v10  ;;  %v1011_v14 = vld [vmem:[#allocation2 + $0x18] sm:$0xff]  ;;  %v143_v16 = vld [vmem:[#allocation7 + $0x30] sm:$0xff] }
  0x5e   :  { %v141_v15 = vld [vmem:[#allocation7 + $0x20] sm:$0xff]  ;;  %103 = vadd.xlane.f32.xlu0 %v102_v8  ;;  %v105_v17 = vadd.f32 %v1011_v14, %v1009_v12  ;;  %v135_v19 = vld [vmem:[#allocation5] sm:$0xff]  ;;  %v136_v20 = vld [vmem:[#allocation5 + $0x8] sm:$0xff] }
  0x5f   :  { %587 = vmatpush1.bf16.msra.mxu0 %v586_v9  ;;  %v590_v18 = vpack.c.bf16 %v143_v16, %v141_v15  ;;  %v246_v21 = vld [vmem:[#allocation8 + $0x8] sm:$0xff]  ;;  %v248_v22 = vld [vmem:[#allocation8 + $0x18] sm:$0xff]  ;;  %v245_v26 = vld [vmem:[#allocation8] sm:$0xff] }
  0x60   :  { %589 = vmatprep.subr.bf16.mxu0 %v588_v13  ;;  %v399_v23 = vld [vmem:[#allocation10 + $0x8] sm:$0xff]  ;;  %v592_v24 = vpack.c.bf16 %v248_v22, %v246_v21  ;;  %v401_v25 = vld [vmem:[#allocation10 + $0x18] sm:$0xff]  ;;  %v247_v27 = vld [vmem:[#allocation8 + $0x10] sm:$0xff] }
  0x61   :  { %v656_v28 = vpack.c.bf16 %v401_v25, %v399_v23  ;;  %v594_v29 = vpack.c.bf16 %v247_v27, %v245_v26  ;;  %v398_v30 = vld [vmem:[#allocation10] sm:$0xff]  ;;  %v400_v31 = vld [vmem:[#allocation10 + $0x10] sm:$0xff]  ;;  %v250_v32 = vld [vmem:[#allocation8 + $0x28] sm:$0xff] }
  0x62   :  { %106 = vadd.xlane.f32.xlu0 %v105_v17  ;;  %593 = vmatprep.subr.bf16.mxu1 %v592_v24  ;;  %v658_v33 = vpack.c.bf16 %v400_v31, %v398_v30  ;;  %v252_v34 = vld [vmem:[#allocation8 + $0x38] sm:$0xff]  ;;  %v403_v35 = vld [vmem:[#allocation10 + $0x28] sm:$0xff]  ;;  %v249_v39 = vld [vmem:[#allocation8 + $0x20] sm:$0xff] }
  0x63   :  { %591 = vmatpush1.bf16.msra.mxu0 %v590_v18  ;;  %v405_v36 = vld [vmem:[#allocation10 + $0x38] sm:$0xff]  ;;  %595 = vmatpush1.bf16.msra.mxu1 %v594_v29  ;;  %v596_v37 = vpack.c.bf16 %v252_v34, %v250_v32  ;;  %v251_v40 = vld [vmem:[#allocation8 + $0x30] sm:$0xff]  ;;  %v402_v41 = vld [vmem:[#allocation10 + $0x20] sm:$0xff] }
  0x64   :  { %657 = vmatprep.subr.bf16.mxu0 %v656_v28  ;;  %v660_v38 = vpack.c.bf16 %v405_v36, %v403_v35  ;;  %v598_v42 = vpack.c.bf16 %v251_v40, %v249_v39  ;;  %v404_v43 = vld [vmem:[#allocation10 + $0x30] sm:$0xff]  ;;  %v254_v44 = vld [vmem:[#allocation8 + $0x48] sm:$0xff]  ;;  %v256_v45 = vld [vmem:[#allocation8 + $0x58] sm:$0xff] }
  0x65   :  { %597 = vmatprep.subr.bf16.mxu1 %v596_v37  ;;  %v662_v46 = vpack.c.bf16 %v404_v43, %v402_v41  ;;  %v600_v47 = vpack.c.bf16 %v256_v45, %v254_v44  ;;  %v407_v48 = vld [vmem:[#allocation10 + $0x48] sm:$0xff]  ;;  %v409_v49 = vld [vmem:[#allocation10 + $0x58] sm:$0xff]  ;;  %v253_v50 = vld [vmem:[#allocation8 + $0x40] sm:$0xff] }
  0x66   :  { %582 = vmatmul.mubr.msk.f32.vlgmr.msra.gmra.mrb[0].mxu0 %vm157_vm0, %v135_v19  ;;  %v664_v51 = vpack.c.bf16 %v409_v49, %v407_v48  ;;  %v255_v52 = vld [vmem:[#allocation8 + $0x50] sm:$0xff]  ;;  %v406_v53 = vld [vmem:[#allocation10 + $0x40] sm:$0xff]  ;;  %v258_v56 = vld [vmem:[#allocation8 + $0x68] sm:$0xff] }
  0x67   :  { %234 = vmatprep.mubr.f32.mxu0 %v884_v0  ;;  %659 = vmatpush1.bf16.msra.mxu0 %v658_v33  ;;  %v408_v54 = vld [vmem:[#allocation10 + $0x50] sm:$0xff]  ;;  %v602_v55 = vpack.c.bf16 %v255_v52, %v253_v50  ;;  %v260_v57 = vld [vmem:[#allocation8 + $0x78] sm:$0xff]  ;;  %v411_v58 = vld [vmem:[#allocation10 + $0x68] sm:$0xff] }
  0x68   :  { %661 = vmatprep.subr.bf16.mxu0 %v660_v38  ;;  %599 = vmatpush1.bf16.msra.mxu1 %v598_v42  ;;  %v666_v59 = vpack.c.bf16 %v408_v54, %v406_v53  ;;  %v604_v60 = vpack.c.bf16 %v260_v57, %v258_v56  ;;  %v413_v61 = vld [vmem:[#allocation10 + $0x78] sm:$0xff]  ;;  %v257_v62 = vld [vmem:[#allocation8 + $0x60] sm:$0xff]  ;;  %v259_v63 = vld [vmem:[#allocation8 + $0x70] sm:$0xff] }
  0x69   :  { %601 = vmatprep.subr.bf16.mxu1 %v600_v47  ;;  %v668_v0 = vpack.c.bf16 %v413_v61, %v411_v58  ;;  %v410_v1 = vld [vmem:[#allocation10 + $0x60] sm:$0xff]  ;;  %v412_v2 = vld [vmem:[#allocation10 + $0x70] sm:$0xff]  ;;  %v262_v4 = vld [vmem:[#allocation8 + $0x88] sm:$0xff]  ;;  %v606_v9 = vpack.c.bf16 %v259_v63, %v257_v62 }
  0x6a   :  { %583 = vmatmul.mubr.msk.f32.gmra.mrb[2].mxu0 %vm157_vm0, %v136_v20  ;;  %v264_v6 = vld [vmem:[#allocation8 + $0x98] sm:$0xff]  ;;  %v415_v7 = vld [vmem:[#allocation10 + $0x88] sm:$0xff]  ;;  %v670_v10 = vpack.c.bf16 %v412_v2, %v410_v1  ;;  %v261_v13 = vld [vmem:[#allocation8 + $0x80] sm:$0xff] }
  0x6b   :  { %663 = vmatpush1.bf16.msra.mxu0 %v662_v46  ;;  %v417_v8 = vld [vmem:[#allocation10 + $0x98] sm:$0xff]  ;;  %v608_v11 = vpack.c.bf16 %v264_v6, %v262_v4  ;;  %v263_v15 = vld [vmem:[#allocation8 + $0x90] sm:$0xff]  ;;  %v414_v16 = vld [vmem:[#allocation10 + $0x80] sm:$0xff] }
  0x6c   :  { %665 = vmatprep.subr.bf16.mxu0 %v664_v51  ;;  %603 = vmatpush1.bf16.msra.mxu1 %v602_v55  ;;  %v672_v17 = vpack.c.bf16 %v417_v8, %v415_v7  ;;  %v416_v18 = vld [vmem:[#allocation10 + $0x90] sm:$0xff]  ;;  %v266_v19 = vld [vmem:[#allocation8 + $0xa8] sm:$0xff]  ;;  %v268_v20 = vld [vmem:[#allocation8 + $0xb8] sm:$0xff]  ;;  %v610_v23 = vpack.c.bf16 %v263_v15, %v261_v13 }
  0x6d   :  { %605 = vmatprep.subr.bf16.mxu1 %v604_v60  ;;  %v419_v21 = vld [vmem:[#allocation10 + $0xa8] sm:$0xff]  ;;  %v421_v22 = vld [vmem:[#allocation10 + $0xb8] sm:$0xff]  ;;  %v674_v24 = vpack.c.bf16 %v416_v18, %v414_v16  ;;  %v612_v25 = vpack.c.bf16 %v268_v20, %v266_v19  ;;  %v265_v26 = vld [vmem:[#allocation8 + $0xa0] sm:$0xff] }
  0x6e   :  { %v267_v27 = vld [vmem:[#allocation8 + $0xb0] sm:$0xff]  ;;  %v418_v28 = vld [vmem:[#allocation10 + $0xa0] sm:$0xff]  ;;  %v676_v29 = vpack.c.bf16 %v421_v22, %v419_v21  ;;  %v270_v31 = vld [vmem:[#allocation8 + $0xc8] sm:$0xff] }
  0x6f   :  { %667 = vmatpush1.bf16.msra.mxu0 %v666_v59  ;;  %v420_v30 = vld [vmem:[#allocation10 + $0xb0] sm:$0xff]  ;;  %v272_v32 = vld [vmem:[#allocation8 + $0xd8] sm:$0xff]  ;;  %v423_v33 = vld [vmem:[#allocation10 + $0xc8] sm:$0xff]  ;;  %v614_v35 = vpack.c.bf16 %v267_v27, %v265_v26 }
  0x70   :  { %669 = vmatprep.subr.bf16.mxu0 %v668_v0  ;;  %607 = vmatpush1.bf16.msra.mxu1 %v606_v9  ;;  %v425_v34 = vld [vmem:[#allocation10 + $0xd8] sm:$0xff]  ;;  %v678_v36 = vpack.c.bf16 %v420_v30, %v418_v28  ;;  %v616_v37 = vpack.c.bf16 %v272_v32, %v270_v31  ;;  %v269_v38 = vld [vmem:[#allocation8 + $0xc0] sm:$0xff]  ;;  %v271_v39 = vld [vmem:[#allocation8 + $0xd0] sm:$0xff] }
  0x71   :  { %609 = vmatprep.subr.bf16.mxu1 %v608_v11  ;;  %v422_v40 = vld [vmem:[#allocation10 + $0xc0] sm:$0xff]  ;;  %v680_v41 = vpack.c.bf16 %v425_v34, %v423_v33  ;;  %v424_v42 = vld [vmem:[#allocation10 + $0xd0] sm:$0xff]  ;;  %v274_v43 = vld [vmem:[#allocation8 + $0xe8] sm:$0xff]  ;;  %v618_v47 = vpack.c.bf16 %v271_v39, %v269_v38 }
  0x72   :  { %v276_v44 = vld [vmem:[#allocation8 + $0xf8] sm:$0xff]  ;;  %v427_v45 = vld [vmem:[#allocation10 + $0xe8] sm:$0xff]  ;;  %v682_v48 = vpack.c.bf16 %v424_v42, %v422_v40  ;;  %v273_v50 = vld [vmem:[#allocation8 + $0xe0] sm:$0xff] }
  0x73   :  { %671 = vmatpush1.bf16.msra.mxu0 %v670_v10  ;;  %v429_v46 = vld [vmem:[#allocation10 + $0xf8] sm:$0xff]  ;;  %v620_v49 = vpack.c.bf16 %v276_v44, %v274_v43  ;;  %v275_v51 = vld [vmem:[#allocation8 + $0xf0] sm:$0xff]  ;;  %v426_v52 = vld [vmem:[#allocation10 + $0xe0] sm:$0xff] }
  0x74   :  { %673 = vmatprep.subr.bf16.mxu0 %v672_v17  ;;  %611 = vmatpush1.bf16.msra.mxu1 %v610_v23  ;;  %v684_v53 = vpack.c.bf16 %v429_v46, %v427_v45  ;;  %v428_v54 = vld [vmem:[#allocation10 + $0xf0] sm:$0xff]  ;;  %v278_v55 = vld [vmem:[#allocation8 + $0x108] sm:$0xff]  ;;  %v280_v56 = vld [vmem:[#allocation8 + $0x118] sm:$0xff]  ;;  %v622_v59 = vpack.c.bf16 %v275_v51, %v273_v50 }
  0x75   :  { %613 = vmatprep.subr.bf16.mxu1 %v612_v25  ;;  %v431_v57 = vld [vmem:[#allocation10 + $0x108] sm:$0xff]  ;;  %v433_v58 = vld [vmem:[#allocation10 + $0x118] sm:$0xff]  ;;  %v686_v60 = vpack.c.bf16 %v428_v54, %v426_v52  ;;  %v624_v61 = vpack.c.bf16 %v280_v56, %v278_v55  ;;  %v277_v62 = vld [vmem:[#allocation8 + $0x100] sm:$0xff] }
  0x76   :  { %v279_v63 = vld [vmem:[#allocation8 + $0x110] sm:$0xff]  ;;  %v430_v0 = vld [vmem:[#allocation10 + $0x100] sm:$0xff]  ;;  %v688_v1 = vpack.c.bf16 %v433_v58, %v431_v57  ;;  %v282_v4 = vld [vmem:[#allocation8 + $0x128] sm:$0xff] }
  0x77   :  { %675 = vmatpush1.bf16.msra.mxu0 %v674_v24  ;;  %v432_v2 = vld [vmem:[#allocation10 + $0x110] sm:$0xff]  ;;  %v284_v6 = vld [vmem:[#allocation8 + $0x138] sm:$0xff]  ;;  %v435_v7 = vld [vmem:[#allocation10 + $0x128] sm:$0xff]  ;;  %v626_v9 = vpack.c.bf16 %v279_v63, %v277_v62 }
  0x78   :  { %677 = vmatprep.subr.bf16.mxu0 %v676_v29  ;;  %615 = vmatpush1.bf16.msra.mxu1 %v614_v35  ;;  %v437_v8 = vld [vmem:[#allocation10 + $0x138] sm:$0xff]  ;;  %v690_v10 = vpack.c.bf16 %v432_v2, %v430_v0  ;;  %v628_v11 = vpack.c.bf16 %v284_v6, %v282_v4  ;;  %v281_v13 = vld [vmem:[#allocation8 + $0x120] sm:$0xff]  ;;  %v283_v15 = vld [vmem:[#allocation8 + $0x130] sm:$0xff] }
  0x79   :  { %617 = vmatprep.subr.bf16.mxu1 %v616_v37  ;;  %v434_v16 = vld [vmem:[#allocation10 + $0x120] sm:$0xff]  ;;  %v692_v17 = vpack.c.bf16 %v437_v8, %v435_v7  ;;  %v436_v18 = vld [vmem:[#allocation10 + $0x130] sm:$0xff]  ;;  %v286_v19 = vld [vmem:[#allocation8 + $0x148] sm:$0xff]  ;;  %v630_v23 = vpack.c.bf16 %v283_v15, %v281_v13 }
  0x7a   :  { %v288_v20 = vld [vmem:[#allocation8 + $0x158] sm:$0xff]  ;;  %v439_v21 = vld [vmem:[#allocation10 + $0x148] sm:$0xff]  ;;  %v694_v24 = vpack.c.bf16 %v436_v18, %v434_v16  ;;  %v285_v26 = vld [vmem:[#allocation8 + $0x140] sm:$0xff] }
  0x7b   :  { %679 = vmatpush1.bf16.msra.mxu0 %v678_v36  ;;  %v441_v22 = vld [vmem:[#allocation10 + $0x158] sm:$0xff]  ;;  %v632_v25 = vpack.c.bf16 %v288_v20, %v286_v19  ;;  %v287_v27 = vld [vmem:[#allocation8 + $0x150] sm:$0xff]  ;;  %v438_v28 = vld [vmem:[#allocation10 + $0x140] sm:$0xff] }
  0x7c   :  { %681 = vmatprep.subr.bf16.mxu0 %v680_v41  ;;  %619 = vmatpush1.bf16.msra.mxu1 %v618_v47  ;;  %v696_v29 = vpack.c.bf16 %v441_v22, %v439_v21  ;;  %v440_v30 = vld [vmem:[#allocation10 + $0x150] sm:$0xff]  ;;  %v290_v31 = vld [vmem:[#allocation8 + $0x168] sm:$0xff]  ;;  %v292_v32 = vld [vmem:[#allocation8 + $0x178] sm:$0xff]  ;;  %v634_v35 = vpack.c.bf16 %v287_v27, %v285_v26 }
  0x7d   :  { %621 = vmatprep.subr.bf16.mxu1 %v620_v49  ;;  %v443_v33 = vld [vmem:[#allocation10 + $0x168] sm:$0xff]  ;;  %v445_v34 = vld [vmem:[#allocation10 + $0x178] sm:$0xff]  ;;  %v698_v36 = vpack.c.bf16 %v440_v30, %v438_v28  ;;  %v636_v37 = vpack.c.bf16 %v292_v32, %v290_v31  ;;  %v289_v38 = vld [vmem:[#allocation8 + $0x160] sm:$0xff] }
  0x7e   :  { %v291_v39 = vld [vmem:[#allocation8 + $0x170] sm:$0xff]  ;;  %v442_v40 = vld [vmem:[#allocation10 + $0x160] sm:$0xff]  ;;  %v700_v41 = vpack.c.bf16 %v445_v34, %v443_v33  ;;  %v294_v43 = vld [vmem:[#allocation8 + $0x188] sm:$0xff] }
  0x7f   :  { %683 = vmatpush1.bf16.msra.mxu0 %v682_v48  ;;  %v444_v42 = vld [vmem:[#allocation10 + $0x170] sm:$0xff]  ;;  %v296_v44 = vld [vmem:[#allocation8 + $0x198] sm:$0xff]  ;;  %v447_v45 = vld [vmem:[#allocation10 + $0x188] sm:$0xff]  ;;  %v638_v47 = vpack.c.bf16 %v291_v39, %v289_v38 }
  0x80   :  { %685 = vmatprep.subr.bf16.mxu0 %v684_v53  ;;  %623 = vmatpush1.bf16.msra.mxu1 %v622_v59  ;;  %v449_v46 = vld [vmem:[#allocation10 + $0x198] sm:$0xff]  ;;  %v702_v48 = vpack.c.bf16 %v444_v42, %v442_v40  ;;  %v640_v49 = vpack.c.bf16 %v296_v44, %v294_v43  ;;  %v293_v50 = vld [vmem:[#allocation8 + $0x180] sm:$0xff]  ;;  %v295_v51 = vld [vmem:[#allocation8 + $0x190] sm:$0xff] }
  0x81   :  { %625 = vmatprep.subr.bf16.mxu1 %v624_v61  ;;  %v446_v52 = vld [vmem:[#allocation10 + $0x180] sm:$0xff]  ;;  %v704_v53 = vpack.c.bf16 %v449_v46, %v447_v45  ;;  %v448_v54 = vld [vmem:[#allocation10 + $0x190] sm:$0xff]  ;;  %v298_v55 = vld [vmem:[#allocation8 + $0x1a8] sm:$0xff]  ;;  %v642_v59 = vpack.c.bf16 %v295_v51, %v293_v50 }
  0x82   :  { %v300_v56 = vld [vmem:[#allocation8 + $0x1b8] sm:$0xff]  ;;  %v451_v57 = vld [vmem:[#allocation10 + $0x1a8] sm:$0xff]  ;;  %v297_v62 = vld [vmem:[#allocation8 + $0x1a0] sm:$0xff] }
  0x83   :  { %687 = vmatpush1.bf16.msra.mxu0 %v686_v60  ;;  %v453_v58 = vld [vmem:[#allocation10 + $0x1b8] sm:$0xff]  ;;  %v706_v60 = vpack.c.bf16 %v448_v54, %v446_v52  ;;  %v644_v61 = vpack.c.bf16 %v300_v56, %v298_v55  ;;  %v299_v63 = vld [vmem:[#allocation8 + $0x1b0] sm:$0xff]  ;;  %v450_v0 = vld [vmem:[#allocation10 + $0x1a0] sm:$0xff] }
  0x84   :  { %689 = vmatprep.subr.bf16.mxu0 %v688_v1  ;;  %627 = vmatpush1.bf16.msra.mxu1 %v626_v9  ;;  %v708_v1 = vpack.c.bf16 %v453_v58, %v451_v57  ;;  %v452_v2 = vld [vmem:[#allocation10 + $0x1b0] sm:$0xff]  ;;  %v302_v4 = vld [vmem:[#allocation8 + $0x1c8] sm:$0xff]  ;;  %v304_v6 = vld [vmem:[#allocation8 + $0x1d8] sm:$0xff]  ;;  %v646_v9 = vpack.c.bf16 %v299_v63, %v297_v62 }
  0x85   :  { %629 = vmatprep.subr.bf16.mxu1 %v628_v11  ;;  %v455_v7 = vld [vmem:[#allocation10 + $0x1c8] sm:$0xff]  ;;  %v457_v8 = vld [vmem:[#allocation10 + $0x1d8] sm:$0xff]  ;;  %v648_v11 = vpack.c.bf16 %v304_v6, %v302_v4  ;;  %v301_v15 = vld [vmem:[#allocation8 + $0x1c0] sm:$0xff] }
  0x86   :  { %v712_v13 = vpack.c.bf16 %v457_v8, %v455_v7  ;;  %v303_v16 = vld [vmem:[#allocation8 + $0x1d0] sm:$0xff]  ;;  %v306_v21 = vld [vmem:[#allocation8 + $0x1e8] sm:$0xff]  ;;  %v308_v22 = vld [vmem:[#allocation8 + $0x1f8] sm:$0xff] }
  0x87   :  { %691 = vmatpush1.bf16.msra.mxu0 %v690_v10  ;;  %v710_v10 = vpack.c.bf16 %v452_v2, %v450_v0  ;;  %v650_v18 = vpack.c.bf16 %v303_v16, %v301_v15  ;;  %v456_v19 = vld [vmem:[#allocation10 + $0x1d0] sm:$0xff]  ;;  %v305_v26 = vld [vmem:[#allocation8 + $0x1e0] sm:$0xff] }
  0x88   :  { %693 = vmatprep.subr.bf16.mxu0 %v692_v17  ;;  %631 = vmatpush1.bf16.msra.mxu1 %v630_v23  ;;  %v454_v17 = vld [vmem:[#allocation10 + $0x1c0] sm:$0xff]  ;;  %v459_v23 = vld [vmem:[#allocation10 + $0x1e8] sm:$0xff]  ;;  %v307_v27 = vld [vmem:[#allocation8 + $0x1f0] sm:$0xff] }
  0x89   :  { %633 = vmatprep.subr.bf16.mxu1 %v632_v25  ;;  %v714_v20 = vpack.c.bf16 %v456_v19, %v454_v17  ;;  %v461_v25 = vld [vmem:[#allocation10 + $0x1f8] sm:$0xff]  ;;  %v458_v30 = vld [vmem:[#allocation10 + $0x1e0] sm:$0xff]  ;;  %v460_v31 = vld [vmem:[#allocation10 + $0x1f0] sm:$0xff] }
  0x8a   :  { %v716_v28 = vpack.c.bf16 %v461_v25, %v459_v23  ;;  %v718_v32 = vpack.c.bf16 %v460_v31, %v458_v30  ;;  %v309_v6 = vld [vmem:[%s1058_s5] sm:$0x3]  ;;  %s885_s5 = smov [#allocation11]  }
  0x8b   :  { %695 = vmatpush1.bf16.msra.mxu0 %v694_v24  ;;  %v652_v24 = vpack.c.bf16 %v308_v22, %v306_v21  ;;  %v462_v7 = vld [vmem:[%s1060_s7] sm:$0x3]  ;;  %s568_s7 = sshll.u32 %s885_s5, 4  ;;  %s569_s7 = int_to_ptr.vmem [resolvable:$true] %s568_s7 }
  0x8c   :  { %697 = vmatprep.subr.bf16.mxu0 %v696_v29  ;;  %635 = vmatpush1.bf16.msra.mxu1 %v634_v35  ;;  %v654_v29 = vpack.c.bf16 %v307_v27, %v305_v26  ;;  %s845_s26 = scalar_lea.vmem %s569_s7, 512  ;;  %p850_p13 = scmp.lt.s32.totalorder %s569_s7, %s569_s7 }
  0x8d   :  { %637 = vmatprep.subr.bf16.mxu1 %v636_v37  ;;  %p846_p12 = scmp.ne.s32.totalorder %s569_s7, %s845_s26  ;;  %p851_p0 = scmp.lt.s32.totalorder %s845_s26, %s845_s26 }
  0x8f   :  { %699 = vmatpush1.bf16.msra.mxu0 %v698_v36  ;;  %p852_p1 = por %p851_p0, %p850_p13 }
  0x90   :  { %701 = vmatprep.subr.bf16.mxu0 %v700_v41  ;;  %639 = vmatpush1.bf16.msra.mxu1 %v638_v47 }
  0x91   :  { %641 = vmatprep.subr.bf16.mxu1 %v640_v49  ;;  %p853_p2 = pnand %p852_p1, %p846_p12 }
  0x93   :  { %703 = vmatpush1.bf16.msra.mxu0 %v702_v48 }
  0x94   :  { %705 = vmatprep.subr.bf16.mxu0 %v704_v53  ;;  %643 = vmatpush1.bf16.msra.mxu1 %v642_v59 }
  0x95   :  { %645 = vmatprep.subr.bf16.mxu1 %v644_v61 }
  0x97   :  { %707 = vmatpush1.bf16.msra.mxu0 %v706_v60 }
  0x98   :  { %709 = vmatprep.subr.bf16.mxu0 %v708_v1  ;;  %647 = vmatpush1.bf16.msra.mxu1 %v646_v9 }
  0x99   :  { %649 = vmatprep.subr.bf16.mxu1 %v648_v11 }
  0x9b   :  { %711 = vmatpush1.bf16.msra.mxu0 %v710_v10 }
  0x9c   :  { %713 = vmatprep.subr.bf16.mxu0 %v712_v13  ;;  %651 = vmatpush1.bf16.msra.mxu1 %v650_v18 }
  0x9d   :  { %653 = vmatprep.subr.bf16.mxu1 %v652_v24 }
  0x9f   :  { %715 = vmatpush1.bf16.msra.mxu0 %v714_v20 }
  0xa0   :  { %717 = vmatprep.subr.bf16.mxu0 %v716_v28  ;;  %655 = vmatpush1.bf16.msra.mxu1 %v654_v29 }
  0xa3   :  { %719 = vmatpush1.bf16.msra.mxu0 %v718_v32 }
  0xeb   :  { %v104_v33 = vpop.xlane.xlu0 %103 }
  0xec   :  { %v109_v34 = vmul.f32 0.00390625, %v104_v33 }
  0xee   :  { %v111_v35 = vsub.f32 %v1003_v3, %v109_v34  ;;  %v112_v36 = vsub.f32 %v1005_v5, %v109_v34  ;;  %v147_v5 = vlaneseq }
  0xef   :  { %v107_v37 = vpop.xlane.xlu0 %106 }
  0xf0   :  { %v110_v38 = vmul.f32 0.00390625, %v107_v37  ;;  %v115_v39 = vmul.f32 %v111_v35, %v111_v35  ;;  %v116_v40 = vmul.f32 %v112_v36, %v112_v36  ;;  %v148_v46 = vshrl.u32 %v147_v5, 7 }
  0xf2   :  { %v1018_v41 = vsub.f32 %v1009_v12, %v110_v38  ;;  %v1021_v42 = vsub.f32 %v1011_v14, %v110_v38  ;;  %v119_v43 = vadd.f32 %v116_v40, %v115_v39  ;;  %v149_v47 = vsub.s32 0, %v148_v46  ;;  %v145_v12 = vld [vmem:[%s1056_s3] sm:$0x3] }
  0xf3   :  { %v153_v48 = vsub.s32 1, %v148_v46 }
  0xf4   :  { %120 = vadd.xlane.f32.xlu1 %v119_v43  ;;  %v117_v44 = vmul.f32 %v1018_v41, %v1018_v41  ;;  %v118_v3 = vmul.f32 %v1021_v42, %v1021_v42  ;;  %v150_v14 = vrot.slane %v145_v12, %v149_v47  ;;  %v314_v8 = vrot.slane %v309_v6, %v149_v47 }
  0xf5   :  { %v154_v49 = vrot.slane %v145_v12, %v153_v48  ;;  %v318_v10 = vrot.slane %v309_v6, %v153_v48  ;;  %v467_v11 = vrot.slane %v462_v7, %v149_v47  ;;  %v471_v16 = vrot.slane %v462_v7, %v153_v48 }
  0xf6   :  { %v122_v45 = vadd.f32 %v118_v3, %v117_v44 }
  0xf8   :  { %123 = vadd.xlane.f32.xlu1 %v122_v45 }
 0x139   :  { %v230_v50 = vpop.f32.mrb[0].mxu0 }
 0x13a   :  { %v231_v51 = vadd.f32 %v230_v50, %v150_v14  ;;  %v232_v52 = vpop.f32.mrb[1].mxu0 }
 0x13b   :  { %v233_v53 = vadd.f32 %v232_v52, %v154_v49 }
 0x13c   :  { %v241_v56 = vmax.f32 %v231_v51, 0.0 }
 0x13d   :  { %v242_v54 = vmax.f32 %v233_v53, 0.0  ;;  %v236_v55 = vpop.f32.mrb[2].mxu0 }
 0x13e   :  { %v237_v57 = vadd.f32 %v236_v55, %v150_v14  ;;  %v238_v58 = vpop.f32.mrb[3].mxu0 }
 0x13f   :  { %v239_v59 = vadd.f32 %v238_v58, %v154_v49  ;;  %385 = vmatprep.mubr.f32.mxu1 %v242_v54  ;;  %538 = vmatprep.mubr.f32.mxu0 %v242_v54 }
 0x140   :  { %386 = vmatmul.mubr.f32.vlgmr.msra.gmra.mrb[0].mxu1 %v241_v56  ;;  %539 = vmatmul.mubr.f32.vlgmr.msra.gmra.mrb[4].mxu0 %v241_v56  ;;  %v243_v61 = vmax.f32 %v237_v57, 0.0 }
 0x141   :  { %v244_v60 = vmax.f32 %v239_v59, 0.0 }
 0x143   :  { %391 = vmatprep.mubr.f32.mxu1 %v244_v60  ;;  %544 = vmatprep.mubr.f32.mxu0 %v244_v60 }
 0x144   :  { %392 = vmatmul.mubr.f32.gmra.mrb[2].mxu1 %v243_v61  ;;  %545 = vmatmul.mubr.f32.gmra.mrb[6].mxu0 %v243_v61 }
 0x181   :  { %v121_v62 = vpop.xlane.xlu1 %120 }
 0x182   :  { %v125_v63 = vmul.f32 0.00390625, %v121_v62 }
 0x184   :  { %v127_v1 = vadd.f32 1e-05, %v125_v63 }
 0x185   :  { %v124_v0 = vpop.xlane.xlu1 %123 }
 0x186   :  { %v126_v2 = vmul.f32 0.00390625, %v124_v0  ;;  %731 = vrsqrt.f32 %v127_v1 }
 0x188   :  { %v128_v4 = vadd.f32 1e-05, %v126_v2 }
 0x18a   :  { %733 = vrsqrt.f32 %v128_v4 }
 0x190   :  { %v732_v9 = vpop.eup %731 }
 0x191   :  { %v131_v17 = vmul.f32 %v732_v9, %v111_v35  ;;  %v132_v22 = vmul.f32 %v732_v9, %v112_v36 }
 0x194   :  { %v734_v21 = vpop.eup %733 }
 0x195   :  { %v133_v31 = vmul.f32 %v734_v21, %v1018_v41  ;;  %v134_v35 = vmul.f32 %v734_v21, %v1021_v42 }
 0x213   :  { %v387_v13 = vpop.f32.mrb[0].mxu1  ;;  %v540_v15 = vpop.f32.mrb[4].mxu0 }
 0x214   :  { %v388_v18 = vadd.f32 %v387_v13, %v314_v8  ;;  %v389_v19 = vpop.f32.mrb[1].mxu1  ;;  %v542_v20 = vpop.f32.mrb[5].mxu0  ;;  %v541_v25 = vadd.f32 %v540_v15, %v467_v11 }
 0x215   :  { %v390_v23 = vadd.f32 %v389_v19, %v318_v10  ;;  %v543_v27 = vadd.f32 %v542_v20, %v471_v16 }
 0x216   :  { %v551_v24 = vmul.f32 %v388_v18, %v131_v17 }
 0x217   :  { %v552_v26 = vmul.f32 %v390_v23, %v132_v22  ;;  %v393_v28 = vpop.f32.mrb[2].mxu1  ;;  %v546_v29 = vpop.f32.mrb[6].mxu0 }
 0x218   :  { %v555_v30 = vadd.f32 %v551_v24, %v541_v25  ;;  %v394_v32 = vadd.f32 %v393_v28, %v314_v8  ;;  %v395_v33 = vpop.f32.mrb[3].mxu1  ;;  %v548_v34 = vpop.f32.mrb[7].mxu0  ;;  %v547_v36 = vadd.f32 %v546_v29, %v467_v11 }
 0x219   :  { %v556_v37 = vadd.f32 %v552_v26, %v543_v27  ;;  %v396_v38 = vadd.f32 %v395_v33, %v318_v10  ;;  %v549_v43 = vadd.f32 %v548_v34, %v471_v16 }
 0x21a   :  { %559 = vst [vmem:[#allocation11] sm:$0xff] %v555_v30  ;;  %v553_v39 = vmul.f32 %v394_v32, %v133_v31 }
 0x21b   :  { %560 = vst [vmem:[#allocation11 + $0x8] sm:$0xff] %v556_v37  ;;  %v554_v40 = vmul.f32 %v396_v38, %v134_v35 }
 0x21c   :  { %v557_v44 = vadd.f32 %v553_v39, %v547_v36 }
 0x21d   :  { %v558_v3 = vadd.f32 %v554_v40, %v549_v43 }
 0x21e   :  { %561 = vst [vmem:[#allocation11 + $0x10] sm:$0xff] %v557_v44 }
 0x21f   :  { %562 = vst [vmem:[#allocation11 + $0x18] sm:$0xff] %v558_v3 }
 0x220   :  { %856 = shalt.err (!%p853_p2)
}
 0x221   :  { %s857_s30 = scalar_lea.hbm %s1061_s8, 512 }
 0x222   :  { %p858_p3 = scmp.ne.s32.totalorder %s1061_s8, %s857_s30  ;;  %p861_p4 = scmp.lt.u32.totalorder %s857_s30, %s1061_s8 }
 0x224   :  { %p863_p5 = pnand %p861_p4, %p858_p3 }
 0x226   :  { %866 = shalt.err (!%p863_p5)
}
 0x227   :  { %574 = dma.vmem_to_hbm [thread:$0]  %s569_s7, 512, %s1061_s8, [#allocation4], %s880_s28, %s880_s28, %s881_s9  }
 0x228   :  { %873 = dma.done.wait [#allocation4], 512  }
 0x229   :  { %874 = vsyncadd [#allocation4], 4294966784 }
 0x22a   :  { %578 = vsyncpa [#allocation3], 1 }
 0x22b   :  { %579 = vsyncpa [#allocation6], 1 }
 0x22c   :  { %580 = vsyncpa [#allocation9], 1 }
 0x22d   :  { %581 = vsyncpa [#allocation4], 1 }

</bundles_post_ra>
